<compile_context>
chip_gen: v5e
topology: v5e:2x2
jax: 0.10.0
libtpu: 0.0.40
codegen_flags: <defaults>
</compile_context>

<pallas_src>
import functools

import jax
import jax.numpy as jnp
import numpy as np
from jax.experimental import pallas as pl
from jax.experimental.pallas import tpu as pltpu


def _local_conv_kernel(x_ref, halo_ref, w_ref, o_ref, *, C, H):
    # x_ref   : (TR, Wc)    tile of flattened image rows (channels-last, lane-dense)
    # halo_ref: (1, 2, Wc)  [row above tile, row below tile] (zeros at image edges)
    # w_ref   : (9, Wc)     flat depthwise taps, source-boundary / pad-lane zeroed
    # o_ref   : (TR, Wc)
    TR, Wc = o_ref.shape

    main = x_ref[...]                  # keep I/O dtype: rolls/selects stay packed for bf16
    halo = halo_ref[0]                 # (2, Wc)
    top, bot = halo[0:1], halo[1:2]    # (1, Wc) each
    taps = w_ref[...]                  # (9, Wc) f32, VMEM-resident across the whole grid

    row = jax.lax.broadcasted_iota(jnp.int32, (TR, Wc), 0)

    # Vertical neighbours: one aligned sublane roll (XLU) each + a VPU select
    # that patches the wrapped boundary row with the halo row.
    up = pltpu.roll(main, 1, axis=0)             # up[r] = main[r-1]
    up = jnp.where(row == 0, top, up)
    dn = pltpu.roll(main, TR - 1, axis=0)        # dn[r] = main[r+1]
    dn = jnp.where(row == TR - 1, bot, dn)
    if TR > H:
        # Batch-blocked tile (several whole images): zero vertical taps that
        # would otherwise leak across internal image boundaries.
        up = jnp.where((row % H == 0) & (row > 0), 0.0, up)
        dn = jnp.where((row % H == H - 1) & (row < TR - 1), 0.0, dn)

    # Multiply-then-shift: accumulate the vertical 3-tap sum per kernel column
    # (f32 accumulate on the VPU), then realize the horizontal taps with only
    # two lane rolls.  Roll wrap-around contributes nothing because the taps
    # are source-side zeroed in the wrapper.
    def col(dw):  # taps dw, dw+3, dw+6 are the dh = 0,1,2 rows of column dw
        return (up * taps[dw:dw + 1] + main * taps[dw + 3:dw + 4]
                + dn * taps[dw + 6:dw + 7])

    out = col(1)                                      # centre column (no shift)
    out = out + pltpu.roll(col(0), C, axis=1)         # left column  -> uses pixel w-1
    out = out + pltpu.roll(col(2), Wc - C, axis=1)    # right column -> uses pixel w+1
    o_ref[...] = out.astype(o_ref.dtype)


def _vmem_limit_bytes():
    """Generation-aware VMEM limit (~half of physical: 64 MiB on v5e/v6e, 32 MiB on v7x)."""
    try:
        cap = int(pltpu.get_tpu_info().vmem_capacity_bytes)
    except Exception:
        cap = 64 * 1024 * 1024
    return max(16 * 1024 * 1024, min(cap // 2, 64 * 1024 * 1024))


def _choose_tile_rows(R, H, Wc, io_itemsize, vmem_limit):
    """Largest valid row-tile whose working set (dbl-buffered I/O blocks at I/O
    dtype + ~6 tile-sized f32 temporaries) fits half the VMEM limit, preferring
    >= 2 grid steps so both v7x TensorCores get work."""
    per_row = Wc * (4 * io_itemsize + 6 * 4)
    cap = max(8, int((vmem_limit // 2) // per_row) // 8 * 8)
    # Valid tiles: multiples of 8 (sublane) dividing B*H that either subdivide
    # an image (TR | H) or hold whole images (H | TR).
    cands = [tr for tr in range(8, R + 1, 8)
             if R % tr == 0 and (H % tr == 0 or tr % H == 0)]
    if not cands:
        return R
    small = [tr for tr in cands if tr <= cap and tr * 2 <= R]
    if small:
        return max(small)
    fitting = [tr for tr in cands if tr <= cap]
    if fitting:
        return max(fitting)
    return min(cands)


def local_conv(x, weight, resolution, tile_rows=None):
    """x: (B, L, C); weight: (C, 1, 3, 3) PyTorch depthwise layout -> (B, L, C)."""
    H, W = resolution
    B, L, C = x.shape
    assert L == H * W, "flatten img_tokens has wrong size"
    R = B * H
    Wc = W * C
    pad = (-Wc) % 128          # keep the lane axis 128-dense (unmasked vst)
    Wcp = Wc + pad

    # Flattened channels-last rows: (B*H, W*C).  Pure reshape (no copy unless
    # lane padding is required).
    rows = x.reshape(R, Wc)
    if pad:
        rows = jnp.pad(rows, ((0, 0), (0, pad)))

    vmem_limit = _vmem_limit_bytes()
    TR = tile_rows if tile_rows is not None else _choose_tile_rows(
        R, H, Wcp, jnp.dtype(x.dtype).itemsize, vmem_limit)
    assert R % TR == 0, "tile_rows must divide B*H"
    assert (H % TR == 0) or (TR % H == 0), "tile_rows must divide H or be a multiple of H"
    assert (TR % 8 == 0) or (TR == R), "tile_rows must be a multiple of 8"
    nT = R // TR

    # Per-tile vertical halo rows (row above / below each tile; zeros at image
    # boundaries).  Tiny gather instead of a full padding pass.
    starts = np.arange(nT) * TR
    top_idx = np.clip(starts - 1, 0, R - 1)
    bot_idx = np.clip(starts + TR, 0, R - 1)
    top_ok = jnp.asarray((starts % H) != 0)[:, None]
    bot_ok = jnp.asarray(((starts + TR) % H) != 0)[:, None]
    zero = jnp.zeros((), dtype=x.dtype)
    top = jnp.where(top_ok, rows[top_idx], zero)
    bot = jnp.where(bot_ok, rows[bot_idx], zero)
    halo = jnp.stack([top, bot], axis=1)                           # (nT, 2, Wcp)

    # Depthwise taps flattened along the W*C lane axis (f32):
    #   tap[dh*3+dw, w*C + c] = weight[c, 0, dh, dw]
    # Source-side boundary masks: the dw=0 column is zeroed at pixel W-1 and
    # the dw=2 column at pixel 0 (and pad lanes are zero), so the in-kernel
    # lane rolls' wrap-around contributes nothing.
    w9c = weight[:, 0, :, :].reshape(C, 9).T.astype(jnp.float32)   # (9, C)
    w_flat = jnp.tile(w9c, (1, W))                                 # (9, Wc)
    lane = jnp.arange(Wc)
    ok_l = (lane < Wc - C).astype(jnp.float32)                     # dw=0: kill source pixel W-1
    ok_r = (lane >= C).astype(jnp.float32)                         # dw=2: kill source pixel 0
    ones = jnp.ones((Wc,), jnp.float32)
    w_flat = w_flat * jnp.stack([ok_l, ones, ok_r] * 3, axis=0)    # (9, Wc)
    if pad:
        w_flat = jnp.pad(w_flat, ((0, 0), (0, pad)))

    kernel = functools.partial(_local_conv_kernel, C=C, H=H)
    out = pl.pallas_call(
        kernel,
        out_shape=jax.ShapeDtypeStruct((R, Wcp), x.dtype),
        grid_spec=pltpu.PrefetchScalarGridSpec(
            num_scalar_prefetch=0,
            grid=(nT,),
            in_specs=[
                pl.BlockSpec((TR, Wcp), lambda t: (t, 0)),
                pl.BlockSpec((1, 2, Wcp), lambda t: (t, 0, 0)),
                pl.BlockSpec((9, Wcp), lambda t: (0, 0)),   # VMEM-resident weights
            ],
            out_specs=pl.BlockSpec((TR, Wcp), lambda t: (t, 0)),
        ),
        compiler_params=pltpu.CompilerParams(
            dimension_semantics=("parallel",),
            vmem_limit_bytes=vmem_limit,
        ),
    )(rows, halo, w_flat)

    if pad:
        out = out[:, :Wc]
    return out.reshape(B, L, C)


def _reference(x, weight, resolution):
    """Pure-JAX reference for the same depthwise conv (channels-last)."""
    H, W = resolution
    B, L, C = x.shape
    x_img = x.astype(jnp.float32).reshape(B, H, W, C)
    x_pad = jnp.pad(x_img, ((0, 0), (1, 1), (1, 1), (0, 0)))
    acc = jnp.zeros((B, H, W, C), jnp.float32)
    for dh in range(3):
        for dw in range(3):
            tap = weight[:, 0, dh, dw].astype(jnp.float32)
            acc = acc + x_pad[:, dh:dh + H, dw:dw + W, :] * tap[None, None, None, :]
    return acc.reshape(B, L, C).astype(x.dtype)


if __name__ == "__main__":
    key = jax.random.PRNGKey(0)
    ks = jax.random.split(key, 8)

    # Case 1: small image, auto tiling -> one whole image per tile, 2 grid steps.
    B, H, W, C = 2, 8, 8, 32
    x = jax.random.normal(ks[0], (B, H * W, C), dtype=jnp.float32)
    w = jax.random.normal(ks[1], (C, 1, 3, 3), dtype=jnp.float32) * 0.1
    out = jax.block_until_ready(local_conv(x, w, (H, W)))
    ref = _reference(x, w, (H, W))
    assert out.shape == (B, H * W, C)
    assert jnp.allclose(out, ref, atol=1e-5, rtol=1e-5)

    # Case 2: tile inside the image (TR < H) -> exercises the halo-row path.
    B2, H2, W2, C2 = 2, 16, 16, 32
    x2 = jax.random.normal(ks[2], (B2, H2 * W2, C2), dtype=jnp.float32)
    w2 = jax.random.normal(ks[3], (C2, 1, 3, 3), dtype=jnp.float32) * 0.1
    out2 = jax.block_until_ready(local_conv(x2, w2, (H2, W2), tile_rows=8))
    ref2 = _reference(x2, w2, (H2, W2))
    assert jnp.allclose(out2, ref2, atol=1e-5, rtol=1e-5)

    # Case 3: batch-blocked tile (TR > H, several whole images per tile) ->
    # exercises the in-kernel internal image-boundary masks.
    B3, H3, W3, C3 = 4, 8, 8, 16
    x3 = jax.random.normal(ks[4], (B3, H3 * W3, C3), dtype=jnp.float32)
    w3 = jax.random.normal(ks[5], (C3, 1, 3, 3), dtype=jnp.float32) * 0.1
    out3 = jax.block_until_ready(local_conv(x3, w3, (H3, W3), tile_rows=16))
    ref3 = _reference(x3, w3, (H3, W3))
    assert jnp.allclose(out3, ref3, atol=1e-5, rtol=1e-5)

    # Case 4: W*C not a multiple of 128 -> exercises the lane-padding guard.
    B4, H4, W4, C4 = 2, 8, 10, 48
    x4 = jax.random.normal(ks[6], (B4, H4 * W4, C4), dtype=jnp.float32)
    w4 = jax.random.normal(ks[7], (C4, 1, 3, 3), dtype=jnp.float32) * 0.1
    out4 = jax.block_until_ready(local_conv(x4, w4, (H4, W4)))
    ref4 = _reference(x4, w4, (H4, W4))
    assert jnp.allclose(out4, ref4, atol=1e-5, rtol=1e-5)

    print("KERNEL_OK")
</pallas_src>

<mosaic_0001>
module attributes {stable_mosaic.version = 11 : i64} {
  func.func @_local_conv_kernel(%arg0: i32, %arg1: memref<8x256xf32, #tpu.memory_space<vmem>>, %arg2: memref<1x2x256xf32, #tpu.memory_space<vmem>>, %arg3: memref<9x256xf32, #tpu.memory_space<vmem>>, %arg4: memref<8x256xf32, #tpu.memory_space<vmem>>) attributes {dimension_semantics = [#tpu.dimension_semantics<parallel>], iteration_bounds = array<i64: 2>, scalar_prefetch = 0 : i64, scratch_operands = 0 : i64, tpu.core_type = #tpu.core_type<tc>, window_params = [{transform_indices = @transform_0, window_bounds = array<i64: 8, 256>}, {transform_indices = @transform_1, window_bounds = array<i64: 1, 2, 256>}, {pipeline_mode = #tpu.pipeline_mode<synchronous>, transform_indices = @transform_2, window_bounds = array<i64: 9, 256>}, {transform_indices = @transform_3, window_bounds = array<i64: 8, 256>}]} {
    %c0 = arith.constant 0 : index
    %c0_0 = arith.constant 0 : index
    %0 = vector.load %arg1[%c0, %c0_0] : memref<8x256xf32, #tpu.memory_space<vmem>>, vector<8x256xf32>
    %c0_1 = arith.constant 0 : index
    %c0_2 = arith.constant 0 : index
    %c0_3 = arith.constant 0 : index
    %1 = vector.load %arg2[%c0_1, %c0_2, %c0_3] : memref<1x2x256xf32, #tpu.memory_space<vmem>>, vector<1x2x256xf32>
    %2 = vector.shape_cast %1 : vector<1x2x256xf32> to vector<2x256xf32>
    %3 = vector.extract_strided_slice %2 {offsets = [0, 0], sizes = [1, 256], strides = [1, 1]} : vector<2x256xf32> to vector<1x256xf32>
    %4 = vector.extract_strided_slice %2 {offsets = [1, 0], sizes = [1, 256], strides = [1, 1]} : vector<2x256xf32> to vector<1x256xf32>
    %c0_4 = arith.constant 0 : index
    %c0_5 = arith.constant 0 : index
    %5 = vector.load %arg3[%c0_4, %c0_5] : memref<9x256xf32, #tpu.memory_space<vmem>>, vector<9x256xf32>
    %6 = tpu.iota {dimensions = array<i32: 0>} : vector<8x256xi32>
    %c1_i32 = arith.constant 1 : i32
    %7 = tpu.dynamic_rotate %0 by %c1_i32 dim 0 : vector<8x256xf32>, i32 -> vector<8x256xf32>
    %c0_i32 = arith.constant 0 : i32
    %8 = vector.broadcast %c0_i32 : i32 to vector<8x256xi32>
    %9 = arith.cmpi eq, %6, %8 : vector<8x256xi32>
    %10 = vector.shape_cast %3 : vector<1x256xf32> to vector<1x256xf32>
    %11 = vector.broadcast %10 : vector<1x256xf32> to vector<8x256xf32>
    %12 = arith.select %9, %11, %7 : vector<8x256xi1>, vector<8x256xf32>
    %c7_i32 = arith.constant 7 : i32
    %13 = tpu.dynamic_rotate %0 by %c7_i32 dim 0 : vector<8x256xf32>, i32 -> vector<8x256xf32>
    %c7_i32_6 = arith.constant 7 : i32
    %14 = vector.broadcast %c7_i32_6 : i32 to vector<8x256xi32>
    %15 = arith.cmpi eq, %6, %14 : vector<8x256xi32>
    %16 = vector.shape_cast %4 : vector<1x256xf32> to vector<1x256xf32>
    %17 = vector.broadcast %16 : vector<1x256xf32> to vector<8x256xf32>
    %18 = arith.select %15, %17, %13 : vector<8x256xi1>, vector<8x256xf32>
    %19 = vector.extract_strided_slice %5 {offsets = [1, 0], sizes = [1, 256], strides = [1, 1]} : vector<9x256xf32> to vector<1x256xf32>
    %20 = vector.broadcast %19 : vector<1x256xf32> to vector<8x256xf32>
    %21 = arith.mulf %12, %20 : vector<8x256xf32>
    %22 = vector.extract_strided_slice %5 {offsets = [4, 0], sizes = [1, 256], strides = [1, 1]} : vector<9x256xf32> to vector<1x256xf32>
    %23 = vector.broadcast %22 : vector<1x256xf32> to vector<8x256xf32>
    %24 = arith.mulf %0, %23 : vector<8x256xf32>
    %25 = arith.addf %21, %24 : vector<8x256xf32>
    %26 = vector.extract_strided_slice %5 {offsets = [7, 0], sizes = [1, 256], strides = [1, 1]} : vector<9x256xf32> to vector<1x256xf32>
    %27 = vector.broadcast %26 : vector<1x256xf32> to vector<8x256xf32>
    %28 = arith.mulf %18, %27 : vector<8x256xf32>
    %29 = arith.addf %25, %28 : vector<8x256xf32>
    %30 = vector.extract_strided_slice %5 {offsets = [0, 0], sizes = [1, 256], strides = [1, 1]} : vector<9x256xf32> to vector<1x256xf32>
    %31 = vector.broadcast %30 : vector<1x256xf32> to vector<8x256xf32>
    %32 = arith.mulf %12, %31 : vector<8x256xf32>
    %33 = vector.extract_strided_slice %5 {offsets = [3, 0], sizes = [1, 256], strides = [1, 1]} : vector<9x256xf32> to vector<1x256xf32>
    %34 = vector.broadcast %33 : vector<1x256xf32> to vector<8x256xf32>
    %35 = arith.mulf %0, %34 : vector<8x256xf32>
    %36 = arith.addf %32, %35 : vector<8x256xf32>
    %37 = vector.extract_strided_slice %5 {offsets = [6, 0], sizes = [1, 256], strides = [1, 1]} : vector<9x256xf32> to vector<1x256xf32>
    %38 = vector.broadcast %37 : vector<1x256xf32> to vector<8x256xf32>
    %39 = arith.mulf %18, %38 : vector<8x256xf32>
    %40 = arith.addf %36, %39 : vector<8x256xf32>
    %c32_i32 = arith.constant 32 : i32
    %41 = tpu.dynamic_rotate %40 by %c32_i32 dim 1 : vector<8x256xf32>, i32 -> vector<8x256xf32>
    %42 = arith.addf %29, %41 : vector<8x256xf32>
    %43 = vector.extract_strided_slice %5 {offsets = [2, 0], sizes = [1, 256], strides = [1, 1]} : vector<9x256xf32> to vector<1x256xf32>
    %44 = vector.broadcast %43 : vector<1x256xf32> to vector<8x256xf32>
    %45 = arith.mulf %12, %44 : vector<8x256xf32>
    %46 = vector.extract_strided_slice %5 {offsets = [5, 0], sizes = [1, 256], strides = [1, 1]} : vector<9x256xf32> to vector<1x256xf32>
    %47 = vector.broadcast %46 : vector<1x256xf32> to vector<8x256xf32>
    %48 = arith.mulf %0, %47 : vector<8x256xf32>
    %49 = arith.addf %45, %48 : vector<8x256xf32>
    %50 = vector.extract_strided_slice %5 {offsets = [8, 0], sizes = [1, 256], strides = [1, 1]} : vector<9x256xf32> to vector<1x256xf32>
    %51 = vector.broadcast %50 : vector<1x256xf32> to vector<8x256xf32>
    %52 = arith.mulf %18, %51 : vector<8x256xf32>
    %53 = arith.addf %49, %52 : vector<8x256xf32>
    %c224_i32 = arith.constant 224 : i32
    %54 = tpu.dynamic_rotate %53 by %c224_i32 dim 1 : vector<8x256xf32>, i32 -> vector<8x256xf32>
    %55 = arith.addf %42, %54 : vector<8x256xf32>
    %c0_7 = arith.constant 0 : index
    %c0_8 = arith.constant 0 : index
    %56 = vector.load %arg4[%c0_7, %c0_8] : memref<8x256xf32, #tpu.memory_space<vmem>>, vector<8x256xf32>
    tpu.vector_store %arg4[%c0_7, %c0_8], %55 {strides = array<i32>} : memref<8x256xf32, #tpu.memory_space<vmem>>, vector<8x256xf32>,
    return
  }
  func.func @transform_0(%arg0: i32) -> (i32, i32) {
    %c0_i32 = arith.constant 0 : i32
    %c0_i32_0 = arith.constant 0 : i32
    return %arg0, %c0_i32 : i32, i32
  }
  func.func @transform_1(%arg0: i32) -> (i32, i32, i32) {
    %c0_i32 = arith.constant 0 : i32
    %c0_i32_0 = arith.constant 0 : i32
    %c0_i32_1 = arith.constant 0 : i32
    return %arg0, %c0_i32, %c0_i32_0 : i32, i32, i32
  }
  func.func @transform_2(%arg0: i32) -> (i32, i32) {
    %c0_i32 = arith.constant 0 : i32
    %c0_i32_0 = arith.constant 0 : i32
    %c0_i32_1 = arith.constant 0 : i32
    return %c0_i32, %c0_i32_0 : i32, i32
  }
  func.func @transform_3(%arg0: i32) -> (i32, i32) {
    %c0_i32 = arith.constant 0 : i32
    %c0_i32_0 = arith.constant 0 : i32
    return %arg0, %c0_i32 : i32, i32
  }
}

</mosaic_0001>

<bundles_post_ra>
// kernel: tpu_custom_call.1
= control target key start
LH: loop header
LB: loop body
LE: loop exit
PB: predicated region body
PF: predicated region fallthrough
CT: control target
= control target key end

     0   :  { %s947_s0 = inlined_call_operand.hbm [shape: f32[16,256], index: 0, kind: input, shape index: {}]   ;;  %s948_s1 = inlined_call_operand.hbm [shape: f32[2,2,256], index: 1, kind: input, shape index: {}]   ;;  %s949_s2 = inlined_call_operand.hbm [shape: f32[9,256], index: 2, kind: input, shape index: {}]   ;;  %s950_s3 = inlined_call_operand.hbm [shape: f32[16,256], index: 3, kind: output, shape index: {}]  }
   0x1   :  { %951 = sst [smem:[#allocation14_spill]] %s949_s2 }
   0x2   :  { %8 = vsyncpa [#allocation3], 0 }
   0x3   :  { %10 = vsyncpa [#allocation3 + $0x1], 0 }
   0x4   :  { %11 = vsyncpa [#allocation6], 0 }
   0x5   :  { %13 = vsyncpa [#allocation6 + $0x1], 0 }
   0x6   :  { %14 = vsyncpa [#allocation4], 0 }
   0x7   :  { %16 = vsyncpa [#allocation4 + $0x1], 0  ;;  %s748_s12 = smov 0   ;;  %s750_s13 = smov 0  }
   0x8   :  { %s752_s14 = smov 0   ;;  %s754_s15 = smov 0  }
   0x9 LB: > { %s952_s2 = sld [smem:[#allocation14_spill]]  ;;  %s772_s19 = sadd.s32 4294967295, %s721_s15   ;;  %s721_s15 = sphi %s754_s15, %s965_s15   ;;  %s717_s14 = sphi %s752_s14, %s964_s14   ;;  %s713_s13 = sphi %s750_s13, %s963_s13   ;;  %s709_s12 = sphi %s748_s12, %s962_s12  }
   0xa   : > { %p467_p0 = scmp.ge.s32.totalorder %s721_s15, 1  ;;  %p43_p1 = scmp.eq.s32.totalorder %s772_s19, 0 }
   0xb   : > { %p126_p2 = scmp.lt.s32.totalorder %s721_s15, 3  ;;  %s723_s21 = smov [#allocation7]  }
   0xc   : > { %s139_s22 = sshll.u32 %s723_s21, 4  ;;  %s724_s23 = smov 256   ;;  %s140_s22 = int_to_ptr.vmem [resolvable:$true] %s139_s22 }
   0xd   : > { %p777_p3 = pnand %p467_p0, %p126_p2  ;;  %s725_s24 = smov 16  }
   0xe   : > { %s466_s25 = sadd.s32 4294967294, %s721_s15   ;;  %s788_s26 = sadd.s32 1, %s721_s15  }
   0xf   : > { %s137_s18 = sshll.u32 %s952_s2, 4  ;;  %p499_p4 = pneg %p777_p3  ;;  %s138_s18 = int_to_ptr.hbm [resolvable:$true] %s137_s18 }
  0x10   : > { %s29_s27 = sadd.s32 1, %s717_s14  ;;  %s26_s28 = ssub.s32 %s721_s15, %s788_s26 }
  0x11   : > { %p500_p6 = pnand %p499_p4, %p43_p1  ;;  %p36_p7 = scmp.ne.s32.totalorder %s717_s14, %s713_s13 }
  0x12   : > { %p27_p8 = scmp.eq.s32.totalorder %s26_s28, 0  ;;  %p37_p9 = scmp.eq.s32.totalorder %s721_s15, 0 }
  0x13   : > { %502 = dma.hbm_to_vmem [thread:$0]  (!%p500_p6), %s138_s18, 512, %s140_s22, [#allocation6], %s724_s23, %s724_s23, %s725_s24  }
  0x14   : > { %p42_p10 = scmp.ne.s32.totalorder %s713_s13, %s709_s12  ;;  %p113_p11 = scmp.eq.s32.totalorder %s772_s19, 1 }
  0x15   : > { %s800_s29 = scalar_select %p27_p8, %s717_s14, %s29_s27  }
  0x16   : > { %p802_p12 = por %p37_p9, %p36_p7  ;;  %p808_p13 = por %p43_p1, %p42_p10 }
  0x17   : > { %954 = sst [smem:[#allocation13_spill]] %s800_s29  ;;  %p812_p0 = por %p113_p11, %p36_p7 }
  0x18   : > { %p119_p2 = scmp.eq.s32.totalorder %s466_s25, 1  ;;  %p515_p4 = scmp.lt.s32.totalorder %s721_s15, 2 }
  0x19   : > { %s818_s6 = sand.u32 1, %s717_s14   ;;  %s486_s9 = sshll.u32 %s721_s15, 4 }
  0x1a   : > { %p820_p6 = por %p119_p2, %p42_p10  ;;  %s470_s8 = sshll.u32 %s818_s6, 4 }
  0x1b   : > { %s162_s16 = scalar_lea.hbm %s947_s0, %s486_s9  ;;  %s157_s18 = scalar_lea.vmem [#allocation2], %s470_s8 }
  0x1c   : > { %s164_s17 = sshll.u32 %s162_s16, 4  ;;  %s166_s21 = sshll.u32 %s157_s18, 4  ;;  %s165_s17 = int_to_ptr.hbm [resolvable:$true] %s164_s17  ;;  %s167_s21 = int_to_ptr.vmem [resolvable:$true] %s166_s21 }
  0x1d   : > { %p831_p7 = pnand %p515_p4, %p802_p12  ;;  %s173_s23 = sand.u32 1, %s721_s15  }
  0x1e   : > { %s473_s24 = sshll.u32 %s818_s6, 2  ;;  %s154_s25 = scalar_lea.sflag [#allocation3], %s818_s6 }
  0x1f   : > { %s587_s27 = sshra.s32 %s165_s17, 4  ;;  %p591_p9 = pneg %p831_p7  ;;  %s588_s27 = int_to_ptr.hbm [resolvable:$true] %s587_s27 }
  0x20   : > { %s589_s28 = scalar_lea.hbm %s588_s27, 16  ;;  %s594_s9 = scalar_lea.hbm %s947_s0, 32 }
  0x21   : > { %p590_p8 = scmp.ne.s32.totalorder %s588_s27, %s589_s28  ;;  %p595_p12 = scmp.lt.s32.totalorder %s588_s27, %s947_s0 }
  0x22   : > { %p596_p2 = scmp.lt.s32.totalorder %s594_s9, %s589_s28 }
  0x23   : > { %p592_p10 = pnand %p591_p9, %p590_p8 }
  0x24   : > { %p597_p4 = por %p596_p2, %p595_p12 }
  0x25   : > { %p593_p11 = pneg %p592_p10 }
  0x27   : > { %p598_p5 = pnand %p597_p4, %p593_p11 }
  0x29   : > { %601 = shalt.err (!%p598_p5)
}
  0x2a   : > { %506 = dma.hbm_to_vmem [thread:$0]  (!%p831_p7), %s165_s17, 256, %s167_s21, %s154_s25  }
  0x2b   : > { %s487_s6 = sshll.u32 %s721_s15, 2  ;;  %s177_s16 = scalar_lea.vmem [#allocation5], %s473_s24 }
  0x2c   : > { %s186_s18 = sshll.u32 %s177_s16, 4  ;;  %s182_s30 = scalar_lea.hbm %s948_s1, %s487_s6  ;;  %s187_s18 = int_to_ptr.vmem [resolvable:$true] %s186_s18 }
  0x2d   : > { %s184_s8 = sshll.u32 %s182_s30, 4  ;;  %s174_s27 = scalar_lea.sflag [#allocation6], %s173_s23  ;;  %s185_s8 = int_to_ptr.hbm [resolvable:$true] %s184_s8 }
  0x2e   : > { %s617_s28 = sshra.s32 %s185_s8, 4  ;;  %s624_s24 = scalar_lea.hbm %s948_s1, 8  ;;  %s618_s28 = int_to_ptr.hbm [resolvable:$true] %s617_s28 }
  0x2f   : > { %s619_s9 = scalar_lea.hbm %s618_s28, 4  ;;  %p625_p11 = scmp.lt.s32.totalorder %s618_s28, %s948_s1 }
  0x30   : > { %p620_p5 = scmp.ne.s32.totalorder %s618_s28, %s619_s9  ;;  %p626_p12 = scmp.lt.s32.totalorder %s624_s24, %s619_s9 }
  0x32   : > { %p622_p8 = pnand %p620_p5, %p591_p9  ;;  %p627_p2 = por %p626_p12, %p625_p11 }
  0x34   : > { %p623_p10 = pneg %p622_p8 }
  0x36   : > { %p628_p4 = pnand %p627_p2, %p623_p10 }
  0x38   : > { %631 = shalt.err (!%p628_p4)
}
  0x39   : > { %509 = dma.hbm_to_vmem [thread:$0]  (!%p831_p7), %s185_s8, 64, %s187_s18, %s174_s27  }
  0x3a   : > { %195 = sbr.rel (%p777_p3) target bundleno = 214 (0xd6), region = 32  ;;  %s869_s2 = sand.u32 (!%p777_p3), 1, %s713_s13  }
  0x3b   : > { %s477_s29 = sshll.u32 (!%p777_p3), %s869_s2, 4  ;;  %s198_s23 = scalar_lea.sflag (!%p777_p3), [#allocation3], %s869_s2 }
  0x3c   : > { %s201_s11 = scalar_lea.vmem (!%p777_p3), [#allocation2], %s477_s29 }
  0x3f   : > { %692 = dma.done.wait (%p808_p13), %s198_s23, 256  }
  0x40   : > { %694 = vsyncadd (%p808_p13), %s198_s23, 4294967040  ;;  %s207_s20 = sand.u32 1, %s772_s19   ;;  %s478_s22 = sshll.u32 %s869_s2, 2 }
  0x41   : > { %s208_s6 = scalar_lea.sflag [#allocation6], %s207_s20  ;;  %s211_s16 = scalar_lea.vmem [#allocation5], %s478_s22 }
  0x42   : > { %696 = dma.done.wait (%p808_p13), %s208_s6, 64  }
  0x43   : > { %698 = vsyncadd (%p808_p13), %s208_s6, 4294967232 }
  0x44   : > { %700 = dma.done.wait (%p43_p1), [#allocation6], 512  }
  0x45   : > { %702 = vsyncadd (%p43_p1), [#allocation6], 4294966784  ;;  %v252_v0 = vlaneseq  ;;  %v890_v2 = vld [vmem:[%s201_s11] sm:$0xff]  ;;  %v892_v4 = vld [vmem:[#allocation7] sm:$0xff]  ;;  %s726_s4 = smov 96   ;;  %s727_s18 = smov 32  }
  0x46   : > { %v247_v3 = vld [vmem:[%s211_s16] sm:$0xf]  ;;  %v254_v5 = vrot.slane %v890_v2, 7  ;;  %v266_v7 = vrot.slane %v890_v2, 1  ;;  %v320_v9 = vperm.slane %v892_v4, 2  ;;  %v324_v10 = vperm.slane %v892_v4, 5 }
  0x47   : > { %v253_v1 = vshrl.u32 %v252_v0, 7  ;;  %v258_v6 = vperm.slane %v247_v3, 0  ;;  %v269_v8 = vperm.slane %v247_v3, 1  ;;  %v555_v11 = vld [vmem:[#allocation7 + $0x10] ss:$0 sm:$0xff]  ;;  %v293_v12 = vperm.slane %v892_v4, 0 }
  0x48   : > { %v297_v13 = vperm.slane %v892_v4, 3  ;;  %v303_v16 = vperm.slane %v892_v4, 6  ;;  %v246_v17 = vld [vmem:[%s201_s11 + $0x8] sm:$0xff]  ;;  %v259_v18 = vperm.slane %v247_v3, 2  ;;  %v326_v19 = vmul.f32 %v324_v10, %v890_v2  ;;  %v249_v21 = vld [vmem:[#allocation7 + $0x8] sm:$0xff]  ;;  %s488_s30 = sshll.u32 %s772_s19, 4 }
  0x49   : > { %vm256_vm0 = vcmp.eq.s32.totalorder %v253_v1, 0  ;;  %vm268_vm1 = vcmp.eq.s32.totalorder %v253_v1, 7  ;;  %v262_v14 = vperm.slane %v258_v6, 0  ;;  %v273_v15 = vperm.slane %v269_v8, 1  ;;  %v556_v38 = vld [vmem:[#allocation7 + $0x18] ss:$0 sm:$0xff]  ;;  %s359_s28 = scalar_lea.hbm %s950_s3, %s488_s30 }
  0x4a   : > { %v299_v20 = vmul.f32 %v297_v13, %v890_v2  ;;  %v255_v22 = vrot.slane %v246_v17, 7  ;;  %v267_v23 = vrot.slane %v246_v17, 1  ;;  %v263_v26 = vperm.slane %v259_v18, 0  ;;  %s244_s9 = scalar_lea.vmem [#allocation8], %s477_s29  ;;  %s363_s19 = sshll.u32 %s359_s28, 4  ;;  %s364_s19 = int_to_ptr.hbm [resolvable:$true] %s363_s19 }
  0x4b   : > { %v264_v24 = vsel %vm256_vm0, %v262_v14, %v254_v5  ;;  %v275_v25 = vsel %vm268_vm1, %v273_v15, %v266_v7  ;;  %v270_v27 = vperm.slane %v247_v3, 3  ;;  %v321_v34 = vperm.slane %v249_v21, 2  ;;  %s361_s17 = sshll.u32 %s244_s9, 4  ;;  %s348_s21 = scalar_lea.sflag [#allocation4], %s869_s2  ;;  %s362_s17 = int_to_ptr.vmem [resolvable:$true] %s361_s17 }
  0x4c   : > { %v322_v28 = vmul.f32 %v320_v9, %v264_v24  ;;  %v332_v29 = vmul.f32 %v555_v11, %v275_v25  ;;  %v295_v30 = vmul.f32 %v293_v12, %v264_v24  ;;  %v305_v31 = vmul.f32 %v303_v16, %v275_v25  ;;  %s661_s24 = sshra.s32 %s364_s19, 4  ;;  %s667_s23 = scalar_lea.hbm %s950_s3, 32  ;;  %s662_s24 = int_to_ptr.hbm [resolvable:$true] %s661_s24 }
  0x4d   : > { %v265_v32 = vsel %vm256_vm0, %v263_v26, %v255_v22  ;;  %v274_v33 = vperm.slane %v270_v27, 1  ;;  %v325_v35 = vperm.slane %v249_v21, 5  ;;  %v294_v39 = vperm.slane %v249_v21, 0  ;;  %s663_s25 = scalar_lea.hbm %s662_s24, 16  ;;  %p668_p7 = scmp.lt.s32.totalorder %s662_s24, %s950_s3 }
  0x4e   : > { %v328_v36 = vadd.f32 %v326_v19, %v322_v28  ;;  %v301_v37 = vadd.f32 %v299_v20, %v295_v30  ;;  %v298_v40 = vperm.slane %v249_v21, 3  ;;  %v323_v42 = vmul.f32 %v321_v34, %v265_v32  ;;  %p664_p1 = scmp.ne.s32.totalorder %s662_s24, %s663_s25  ;;  %p669_p9 = scmp.lt.s32.totalorder %s667_s23, %s663_s25 }
  0x4f   : > { %v276_v41 = vsel %vm268_vm1, %v274_v33, %v267_v23  ;;  %v327_v43 = vmul.f32 %v325_v35, %v246_v17  ;;  %v304_v44 = vperm.slane %v249_v21, 6  ;;  %v296_v47 = vmul.f32 %v294_v39, %v265_v32 }
  0x50   : > { %v334_v45 = vadd.f32 %v332_v29, %v328_v36  ;;  %v307_v46 = vadd.f32 %v305_v31, %v301_v37  ;;  %v300_v48 = vmul.f32 %v298_v40, %v246_v17  ;;  %v333_v50 = vmul.f32 %v556_v38, %v276_v41  ;;  %p665_p3 = pnand %p664_p1, %p812_p0  ;;  %p670_p5 = por %p669_p9, %p668_p7 }
  0x51   : > { %v329_v49 = vadd.f32 %v327_v43, %v323_v42  ;;  %v306_v51 = vmul.f32 %v304_v44, %v276_v41  ;;  %v278_v55 = vperm.slane %v249_v21, 1  ;;  %v281_v56 = vperm.slane %v892_v4, 4 }
  0x52   : > { %336 = vrot.lane.b32.xlu1 %v334_v45, %s726_s4  ;;  %309 = vrot.lane.b32.xlu0 %v307_v46, %s727_s18  ;;  %v302_v52 = vadd.f32 %v300_v48, %v296_v47  ;;  %v277_v57 = vperm.slane %v892_v4, 1  ;;  %v282_v58 = vperm.slane %v249_v21, 4  ;;  %v287_v62 = vperm.slane %v892_v4, 7  ;;  %p666_p13 = pneg %p665_p3 }
  0x53   : > { %v335_v53 = vadd.f32 %v333_v50, %v329_v49  ;;  %v280_v59 = vmul.f32 %v278_v55, %v265_v32  ;;  %v283_v60 = vmul.f32 %v281_v56, %v890_v2  ;;  %v288_v63 = vperm.slane %v249_v21, 7 }
  0x54   : > { %v308_v54 = vadd.f32 %v306_v51, %v302_v52  ;;  %v284_v61 = vmul.f32 %v282_v58, %v246_v17  ;;  %v279_v1 = vmul.f32 %v277_v57, %v264_v24  ;;  %v314_v6 = vand.u32 127, %v252_v0  ;;  %p671_p8 = pnand %p670_p5, %p666_p13 }
  0x55   : > { %v289_v8 = vmul.f32 %v287_v62, %v275_v25  ;;  %v290_v9 = vmul.f32 %v288_v63, %v276_v41 }
  0x56   : > { %v286_v7 = vadd.f32 %v284_v61, %v280_v59  ;;  %v285_v10 = vadd.f32 %v283_v60, %v279_v1  ;;  %vm315_vm2 = vcmp.lt.s32.totalorder %v314_v6, 32  ;;  %vm340_vm3 = vcmp.lt.s32.totalorder %v314_v6, 96 }
  0x58   : > { %v292_v11 = vadd.f32 %v290_v9, %v286_v7  ;;  %v291_v12 = vadd.f32 %v289_v8, %v285_v10 }
  0x5a   : > { %338 = vrot.lane.b32.xlu1 %v335_v53, %s726_s4  ;;  %311 = vrot.lane.b32.xlu0 %v308_v54, %s727_s18 }
  0xc4   : > { %v337_v3 = vpop.permute.xlu1 %336  ;;  %v310_v5 = vpop.permute.xlu0 %309 }
  0xcc   : > { %v339_v2 = vpop.permute.xlu1 %338  ;;  %v312_v4 = vpop.permute.xlu0 %311 }
  0xcd   : > { %v316_v13 = vsel %vm315_vm2, %v310_v5, %v312_v4  ;;  %v317_v14 = vsel %vm315_vm2, %v312_v4, %v310_v5  ;;  %v341_v16 = vsel %vm340_vm3, %v337_v3, %v339_v2  ;;  %v342_v17 = vsel %vm340_vm3, %v339_v2, %v337_v3 }
  0xce   : > { %v318_v0 = vadd.f32 %v317_v14, %v291_v12  ;;  %v319_v15 = vadd.f32 %v316_v13, %v292_v11 }
  0xd0   : > { %v343_v18 = vadd.f32 %v341_v16, %v318_v0  ;;  %v344_v19 = vadd.f32 %v342_v17, %v319_v15 }
  0xd2   : > { %345 = vst [vmem:[%s244_s9] sm:$0xff] %v343_v18 }
  0xd3   : > { %346 = vst [vmem:[%s244_s9 + $0x8] sm:$0xff] %v344_v19 }
  0xd4   : > { %674 = shalt.err (!%p671_p8)
}
  0xd5   : > { %497 = dma.vmem_to_hbm [thread:$0]  (%p812_p0), %s362_s17, 256, %s364_s19, %s348_s21  }
  0xd6 PF: > { %s375_s2 = sand.u32 1, %s709_s12   ;;  %p960_p10 = scmp.ge.s32.totalorder %s721_s15, 2 }
  0xd7   : > { %s376_s22 = scalar_lea.sflag [#allocation4], %s375_s2 }
  0xd8   : > { %p511_p11 = pnand %p960_p10, %p820_p6 }
  0xda   : > { %p512_p12 = pneg %p511_p11 }
  0xdc   : > { %704 = dma.done.wait (%p512_p12), %s376_s22, 256  }
  0xdd   : > { %706 = vsyncadd (%p512_p12), %s376_s22, 4294967040  ;;  %s961_s6 = sld [smem:[#allocation13_spill]]  ;;  %p19_p2 = scmp.ge.s32.totalorder %s788_s26, 4  }
  0xde   : > { %s962_s12 = smov %s713_s13  ;;  %s963_s13 = smov %s717_s14 }
  0xdf   : > { %s965_s15 = smov %s788_s26  ;;  %21 = sbr.rel (!%p19_p2) target bundleno = 9 (0x9), region = 94 }
  0xe3   : > { %s964_s14 = smov %s961_s6 }
  0xe4   :  { %382 = vsyncpa [#allocation3], 1 }
  0xe5   :  { %384 = vsyncpa [#allocation3 + $0x1], 1 }
  0xe6   :  { %385 = vsyncpa [#allocation6], 1 }
  0xe7   :  { %387 = vsyncpa [#allocation6 + $0x1], 1 }
  0xe8   :  { %388 = vsyncpa [#allocation4], 1 }
  0xe9   :  { %390 = vsyncpa [#allocation4 + $0x1], 1 }

</bundles_post_ra>
